<compile_context>
chip_gen: v6e
topology: v6e:2x2x1
jax: 0.10.0
libtpu: 0.0.40
codegen_flags: <defaults>
</compile_context>

<pallas_src>
import functools

import jax
import jax.numpy as jnp
from jax import lax
from jax.experimental import pallas as pl
from jax.experimental.pallas import tpu as pltpu


_UNROLL_CAP = 64   # chunks up to this many steps are fully unrolled
_GROUP = 8         # bounded-unroll factor for longer chunks


def _round_up(n, m):
    return ((n + m - 1) // m) * m


def _pick_time_chunk(T, max_chunk):
    """Largest TT <= max_chunk with T % TT == 0 and (TT % 8 == 0 or TT == T)."""
    max_chunk = max(1, max_chunk)
    if T <= max_chunk:
        return T
    for tt in range(max_chunk - (max_chunk % 8), 7, -8):
        if T % tt == 0:
            return tt
    # TODO(synk): remainder-chunk handling for prime / awkward long T.
    return T


def _vmem_budget_bytes():
    """Generation-aware VMEM budget used to size the time chunk."""
    try:
        cap = getattr(pltpu.get_tpu_info(), "vmem_capacity_bytes", 64 * 2**20)
    except Exception:
        cap = 64 * 2**20
    # ~1/3 of physical, capped: ~21 MiB on v7x (64 MiB), 40 MiB on v5e/v6e (128 MiB)
    return max(8 * 2**20, min(cap // 3, 40 * 2**20))


def _rnn_kernel(x_ref, wih_ref, whh_ref, b_ref, h_ref, *xp_scratch):
    """One grid step == one chunk of TT timesteps for one batch tile.

    Grid is (batch_tiles, time_chunks).  The (bt, H) output block has a constant
    index_map along the time axis, so it stays resident in VMEM and is the
    hidden-state carry.  xp_scratch is present only for long chunks
    (TT > _UNROLL_CAP) and holds the projected gates for bounded-unroll iteration.
    """
    c = pl.program_id(1)                               # time-chunk axis (innermost)

    @pl.when(c == 0)
    def _():
        h_ref[...] = jnp.zeros_like(h_ref)

    Bt, TT, D = x_ref.shape
    H = whh_ref.shape[1]
    cdt = whh_ref.dtype                                # MXU dtype (bf16 default)

    # Hoisted input projection: ONE (Bt*TT, D) x (D, H) MXU GEMM per chunk,
    # both RNN biases pre-folded into b_ref.
    xc = x_ref[...].reshape(Bt * TT, D).astype(cdt)
    xp = jnp.dot(xc, wih_ref[...], preferred_element_type=jnp.float32)
    xp = (xp + b_ref[...]).reshape(Bt, TT, H)          # f32 gates (Bt, TT, H)

    whh = whh_ref[...]
    h = h_ref[...]                                     # f32 carry (Bt, H)

    def cell(x_t, h):
        # bias-add / tanh stay f32 (v5e VPU/EUP have no bf16 path); the only
        # per-step cast is h -> MXU dtype for the recurrent matmul.
        return jnp.tanh(x_t + jnp.dot(h.astype(cdt), whh,
                                      preferred_element_type=jnp.float32))

    if TT <= _UNROLL_CAP:
        # Full static unroll: maximum LLO scheduling visibility.
        for i in range(TT):
            h = cell(xp[:, i, :], h)
    else:
        # Bounded unroll: park the gates in VMEM scratch and walk them in
        # aligned _GROUP-step slices (dynamic ds on the sublane axis, 8-aligned).
        xp_ref = xp_scratch[0]
        xp_ref[...] = xp
        n_groups = TT // _GROUP

        def group(g, hh):
            base = pl.multiple_of(g * _GROUP, _GROUP)
            blk = xp_ref[:, pl.ds(base, _GROUP), :]    # (Bt, _GROUP, H)
            for t in range(_GROUP):
                hh = cell(blk[:, t, :], hh)
            return hh

        h = lax.fori_loop(0, n_groups, group, h)
        for i in range(n_groups * _GROUP, TT):         # static tail (< _GROUP)
            h = cell(xp_ref[:, i, :], h)

    h_ref[...] = h


@functools.partial(jax.jit, static_argnames=("compute_dtype", "max_time_chunk"))
def rnn_forward(x_btd, w_ih, w_hh, b_ih, b_hh, w_fc, b_fc,
                *, compute_dtype=jnp.bfloat16, max_time_chunk=256):
    """x_btd: (B, T, D) batch-first, like the PyTorch module.

    Weights follow PyTorch conventions:
      w_ih: (H, D), w_hh: (H, H), b_ih/b_hh: (H,), w_fc: (2, H), b_fc: (2,)
    """
    B, T, D = x_btd.shape
    H = w_hh.shape[0]

    # Optional 2-way batch split across TensorCores (v7x megacore).  Only pays
    # when each core keeps >= 8 batch rows (one full sublane group); gated so
    # the (8,128) constraint on the (bt, H) carry block always holds.
    nb = 2 if (B % 16 == 0) else 1
    bt = B // nb

    x_bytes = jnp.dtype(x_btd.dtype).itemsize
    c_bytes = jnp.dtype(compute_dtype).itemsize
    lane_D = _round_up(D, 128)
    lane_H = _round_up(H, 128)

    # Honest, (8,128)-padded VMEM accounting (per timestep of the chunk + fixed).
    per_t = (bt * lane_D * (2 * x_bytes + c_bytes)      # dbl-buffered x + cast copy
             + 2 * bt * lane_H * 4)                     # f32 gates: value + scratch
    fixed = (2 * (_round_up(D, 8) + _round_up(H, 8)) * lane_H * c_bytes  # weights
             + 2 * 8 * lane_H * 4                       # folded bias block
             + 2 * _round_up(bt, 8) * lane_H * 4)       # resident (bt, H) carry

    budget = _vmem_budget_bytes()
    avail = max(budget - fixed, 8 * per_t)
    tt_cap = max(8, (avail // per_t) // 8 * 8)
    TT = _pick_time_chunk(T, min(max_time_chunk, tt_cap))
    n_chunks = T // TT

    vmem_need = fixed + TT * per_t
    vmem_limit = int(max(4 * 2**20, 2 * vmem_need))

    # One-time layout prep in XLA: pre-transposed weights, folded biases, one cast.
    wih_t = jnp.transpose(w_ih).astype(compute_dtype)   # (D, H)
    whh_t = jnp.transpose(w_hh).astype(compute_dtype)   # (H, H)
    bias = (b_ih + b_hh).astype(jnp.float32).reshape(1, H)

    scratch = ([pltpu.VMEM((bt, TT, H), jnp.float32)]
               if TT > _UNROLL_CAP else [])

    h_last = pl.pallas_call(
        _rnn_kernel,
        out_shape=jax.ShapeDtypeStruct((B, H), jnp.float32),
        grid_spec=pltpu.PrefetchScalarGridSpec(
            num_scalar_prefetch=0,
            grid=(nb, n_chunks),
            in_specs=[
                pl.BlockSpec((bt, TT, D), lambda bi, ci: (bi, ci, 0)),  # x chunk
                pl.BlockSpec((D, H), lambda bi, ci: (0, 0)),            # W_ih^T
                pl.BlockSpec((H, H), lambda bi, ci: (0, 0)),            # W_hh^T
                pl.BlockSpec((1, H), lambda bi, ci: (0, 0)),            # b_ih+b_hh
            ],
            out_specs=pl.BlockSpec((bt, H), lambda bi, ci: (bi, 0)),    # carry
            scratch_shapes=scratch,
        ),
        compiler_params=pltpu.CompilerParams(
            dimension_semantics=("parallel", "arbitrary"),  # batch x time(serial)
            vmem_limit_bytes=vmem_limit),
    )(x_btd, wih_t, whh_t, bias)

    # Tiny (H, 2) FC head in XLA: keeps the Pallas output lane-dense (B, H)
    # instead of a masked 2-lane store inside the kernel.
    return h_last @ jnp.transpose(w_fc).astype(jnp.float32) + b_fc.astype(jnp.float32)


def _reference(x_btd, w_ih, w_hh, b_ih, b_hh, w_fc, b_fc):
    """Pure-JAX reference matching torch.nn.RNN(batch_first=True) + Linear."""
    B, T, D = x_btd.shape
    H = w_hh.shape[0]
    h = jnp.zeros((B, H), jnp.float32)
    for t in range(T):
        h = jnp.tanh(x_btd[:, t, :] @ w_ih.T + b_ih + h @ w_hh.T + b_hh)
    return h @ w_fc.T + b_fc


if __name__ == "__main__":
    B, T, D, H, O = 2, 8, 4, 32, 2

    key = jax.random.PRNGKey(0)
    ks = jax.random.split(key, 10)
    bound = 1.0 / (H ** 0.5)  # PyTorch default init range for nn.RNN / Linear
    w_ih = jax.random.uniform(ks[0], (H, D), jnp.float32, -bound, bound)
    w_hh = jax.random.uniform(ks[1], (H, H), jnp.float32, -bound, bound)
    b_ih = jax.random.uniform(ks[2], (H,), jnp.float32, -bound, bound)
    b_hh = jax.random.uniform(ks[3], (H,), jnp.float32, -bound, bound)
    w_fc = jax.random.uniform(ks[4], (O, H), jnp.float32, -bound, bound)
    b_fc = jax.random.uniform(ks[5], (O,), jnp.float32, -bound, bound)
    x = jax.random.normal(ks[6], (B, T, D), jnp.float32)

    ref = _reference(x, w_ih, w_hh, b_ih, b_hh, w_fc, b_fc)

    # 1) f32 compute path: tight agreement with the PyTorch-equivalent reference.
    out_f32 = jax.block_until_ready(
        rnn_forward(x, w_ih, w_hh, b_ih, b_hh, w_fc, b_fc,
                    compute_dtype=jnp.float32))
    assert out_f32.shape == (B, O)
    assert jnp.allclose(out_f32, ref, atol=1e-4, rtol=1e-4), (out_f32, ref)

    # 2) Default bf16-MXU path (f32 accumulation / carry): loose agreement.
    out_bf16 = jax.block_until_ready(
        rnn_forward(x, w_ih, w_hh, b_ih, b_hh, w_fc, b_fc))
    assert out_bf16.shape == (B, O)
    assert jnp.allclose(out_bf16, ref, atol=5e-2, rtol=5e-2), (out_bf16, ref)

    # 3) Multi-chunk path (grid (1, 4)): carry across grid steps via the resident
    #    output block.
    x2 = jax.random.normal(ks[7], (B, 32, D), jnp.float32)
    ref2 = _reference(x2, w_ih, w_hh, b_ih, b_hh, w_fc, b_fc)
    out2 = jax.block_until_ready(
        rnn_forward(x2, w_ih, w_hh, b_ih, b_hh, w_fc, b_fc,
                    compute_dtype=jnp.float32, max_time_chunk=8))
    assert jnp.allclose(out2, ref2, atol=1e-3, rtol=1e-3), (out2, ref2)

    # 4) Long-chunk path (TT=128 > 64): bounded-unroll fori_loop over the VMEM
    #    gate scratch.
    x3 = jax.random.normal(ks[8], (B, 128, D), jnp.float32)
    ref3 = _reference(x3, w_ih, w_hh, b_ih, b_hh, w_fc, b_fc)
    out3 = jax.block_until_ready(
        rnn_forward(x3, w_ih, w_hh, b_ih, b_hh, w_fc, b_fc,
                    compute_dtype=jnp.float32))
    assert jnp.allclose(out3, ref3, atol=2e-3, rtol=2e-3), (out3, ref3)

    # 5) Batch-split path (B=16 -> 2 "parallel" batch tiles of 8 rows).
    x4 = jax.random.normal(ks[9], (16, 16, D), jnp.float32)
    ref4 = _reference(x4, w_ih, w_hh, b_ih, b_hh, w_fc, b_fc)
    out4 = jax.block_until_ready(
        rnn_forward(x4, w_ih, w_hh, b_ih, b_hh, w_fc, b_fc,
                    compute_dtype=jnp.float32))
    assert jnp.allclose(out4, ref4, atol=1e-3, rtol=1e-3), (out4, ref4)

    print("KERNEL_OK")
</pallas_src>

<mosaic_0001>
module attributes {stable_mosaic.version = 11 : i64} {
  func.func @_rnn_kernel(%arg0: i32, %arg1: i32, %arg2: memref<2x8x4xf32, #tpu.memory_space<vmem>>, %arg3: memref<4x32xf32, #tpu.memory_space<vmem>>, %arg4: memref<32x32xf32, #tpu.memory_space<vmem>>, %arg5: memref<1x32xf32, #tpu.memory_space<vmem>>, %arg6: memref<2x32xf32, #tpu.memory_space<vmem>>) attributes {dimension_semantics = [#tpu.dimension_semantics<parallel>, #tpu.dimension_semantics<arbitrary>], iteration_bounds = array<i64: 1, 1>, scalar_prefetch = 0 : i64, scratch_operands = 0 : i64, tpu.core_type = #tpu.core_type<tc>, window_params = [{transform_indices = @transform_0, window_bounds = array<i64: 2, 8, 4>}, {pipeline_mode = #tpu.pipeline_mode<synchronous>, transform_indices = @transform_1, window_bounds = array<i64: 4, 32>}, {pipeline_mode = #tpu.pipeline_mode<synchronous>, transform_indices = @transform_2, window_bounds = array<i64: 32, 32>}, {pipeline_mode = #tpu.pipeline_mode<synchronous>, transform_indices = @transform_3, window_bounds = array<i64: 1, 32>}, {transform_indices = @transform_4, window_bounds = array<i64: 2, 32>}]} {
    %c0_i32 = arith.constant 0 : i32
    %0 = arith.cmpi eq, %arg1, %c0_i32 : i32
    %1 = arith.extui %0 : i1 to i32
    %c0_i32_0 = arith.constant 0 : i32
    %2 = arith.cmpi ne, %1, %c0_i32_0 : i32
    scf.if %2 {
      %cst_21 = arith.constant 0.000000e+00 : f32
      %54 = vector.broadcast %cst_21 : f32 to vector<2x32xf32>
      %c0_22 = arith.constant 0 : index
      %c0_23 = arith.constant 0 : index
      %55 = vector.load %arg6[%c0_22, %c0_23] : memref<2x32xf32, #tpu.memory_space<vmem>>, vector<2x32xf32>
      tpu.vector_store %arg6[%c0_22, %c0_23], %54 {strides = array<i32>} : memref<2x32xf32, #tpu.memory_space<vmem>>, vector<2x32xf32>,
    } else {
    }
    %c0 = arith.constant 0 : index
    %c0_1 = arith.constant 0 : index
    %c0_2 = arith.constant 0 : index
    %3 = vector.load %arg2[%c0, %c0_1, %c0_2] : memref<2x8x4xf32, #tpu.memory_space<vmem>>, vector<2x8x4xf32>
    %4 = vector.shape_cast %3 : vector<2x8x4xf32> to vector<16x4xf32>
    %c0_3 = arith.constant 0 : index
    %c0_4 = arith.constant 0 : index
    %5 = vector.load %arg3[%c0_3, %c0_4] : memref<4x32xf32, #tpu.memory_space<vmem>>, vector<4x32xf32>
    %cst = arith.constant dense<0.000000e+00> : vector<16x32xf32>
    %6 = tpu.matmul %4, %5, %cst {dimension_numbers = #tpu.dot_dimension_numbers<[1], [0], [0], [1], [0, 0, 1, 1], [], []>} : vector<16x4xf32>, vector<4x32xf32>, vector<16x32xf32> -> vector<16x32xf32>
    %c0_5 = arith.constant 0 : index
    %c0_6 = arith.constant 0 : index
    %7 = vector.load %arg5[%c0_5, %c0_6] : memref<1x32xf32, #tpu.memory_space<vmem>>, vector<1x32xf32>
    %8 = vector.broadcast %7 : vector<1x32xf32> to vector<16x32xf32>
    %9 = arith.addf %6, %8 : vector<16x32xf32>
    %10 = vector.shape_cast %9 : vector<16x32xf32> to vector<2x8x32xf32>
    %c0_7 = arith.constant 0 : index
    %c0_8 = arith.constant 0 : index
    %11 = vector.load %arg4[%c0_7, %c0_8] : memref<32x32xf32, #tpu.memory_space<vmem>>, vector<32x32xf32>
    %c0_9 = arith.constant 0 : index
    %c0_10 = arith.constant 0 : index
    %12 = vector.load %arg6[%c0_9, %c0_10] : memref<2x32xf32, #tpu.memory_space<vmem>>, vector<2x32xf32>
    %13 = vector.extract_strided_slice %10 {offsets = [0, 0, 0], sizes = [2, 1, 32], strides = [1, 1, 1]} : vector<2x8x32xf32> to vector<2x1x32xf32>
    %14 = vector.shape_cast %13 : vector<2x1x32xf32> to vector<2x32xf32>
    %cst_11 = arith.constant dense<0.000000e+00> : vector<2x32xf32>
    %15 = tpu.matmul %12, %11, %cst_11 {dimension_numbers = #tpu.dot_dimension_numbers<[1], [0], [0], [1], [0, 0, 1, 1], [], []>} : vector<2x32xf32>, vector<32x32xf32>, vector<2x32xf32> -> vector<2x32xf32>
    %16 = arith.addf %14, %15 : vector<2x32xf32>
    %17 = math.tanh %16 : vector<2x32xf32>
    %18 = vector.extract_strided_slice %10 {offsets = [0, 1, 0], sizes = [2, 1, 32], strides = [1, 1, 1]} : vector<2x8x32xf32> to vector<2x1x32xf32>
    %19 = vector.shape_cast %18 : vector<2x1x32xf32> to vector<2x32xf32>
    %cst_12 = arith.constant dense<0.000000e+00> : vector<2x32xf32>
    %20 = tpu.matmul %17, %11, %cst_12 {dimension_numbers = #tpu.dot_dimension_numbers<[1], [0], [0], [1], [0, 0, 1, 1], [], []>} : vector<2x32xf32>, vector<32x32xf32>, vector<2x32xf32> -> vector<2x32xf32>
    %21 = arith.addf %19, %20 : vector<2x32xf32>
    %22 = math.tanh %21 : vector<2x32xf32>
    %23 = vector.extract_strided_slice %10 {offsets = [0, 2, 0], sizes = [2, 1, 32], strides = [1, 1, 1]} : vector<2x8x32xf32> to vector<2x1x32xf32>
    %24 = vector.shape_cast %23 : vector<2x1x32xf32> to vector<2x32xf32>
    %cst_13 = arith.constant dense<0.000000e+00> : vector<2x32xf32>
    %25 = tpu.matmul %22, %11, %cst_13 {dimension_numbers = #tpu.dot_dimension_numbers<[1], [0], [0], [1], [0, 0, 1, 1], [], []>} : vector<2x32xf32>, vector<32x32xf32>, vector<2x32xf32> -> vector<2x32xf32>
    %26 = arith.addf %24, %25 : vector<2x32xf32>
    %27 = math.tanh %26 : vector<2x32xf32>
    %28 = vector.extract_strided_slice %10 {offsets = [0, 3, 0], sizes = [2, 1, 32], strides = [1, 1, 1]} : vector<2x8x32xf32> to vector<2x1x32xf32>
    %29 = vector.shape_cast %28 : vector<2x1x32xf32> to vector<2x32xf32>
    %cst_14 = arith.constant dense<0.000000e+00> : vector<2x32xf32>
    %30 = tpu.matmul %27, %11, %cst_14 {dimension_numbers = #tpu.dot_dimension_numbers<[1], [0], [0], [1], [0, 0, 1, 1], [], []>} : vector<2x32xf32>, vector<32x32xf32>, vector<2x32xf32> -> vector<2x32xf32>
    %31 = arith.addf %29, %30 : vector<2x32xf32>
    %32 = math.tanh %31 : vector<2x32xf32>
    %33 = vector.extract_strided_slice %10 {offsets = [0, 4, 0], sizes = [2, 1, 32], strides = [1, 1, 1]} : vector<2x8x32xf32> to vector<2x1x32xf32>
    %34 = vector.shape_cast %33 : vector<2x1x32xf32> to vector<2x32xf32>
    %cst_15 = arith.constant dense<0.000000e+00> : vector<2x32xf32>
    %35 = tpu.matmul %32, %11, %cst_15 {dimension_numbers = #tpu.dot_dimension_numbers<[1], [0], [0], [1], [0, 0, 1, 1], [], []>} : vector<2x32xf32>, vector<32x32xf32>, vector<2x32xf32> -> vector<2x32xf32>
    %36 = arith.addf %34, %35 : vector<2x32xf32>
    %37 = math.tanh %36 : vector<2x32xf32>
    %38 = vector.extract_strided_slice %10 {offsets = [0, 5, 0], sizes = [2, 1, 32], strides = [1, 1, 1]} : vector<2x8x32xf32> to vector<2x1x32xf32>
    %39 = vector.shape_cast %38 : vector<2x1x32xf32> to vector<2x32xf32>
    %cst_16 = arith.constant dense<0.000000e+00> : vector<2x32xf32>
    %40 = tpu.matmul %37, %11, %cst_16 {dimension_numbers = #tpu.dot_dimension_numbers<[1], [0], [0], [1], [0, 0, 1, 1], [], []>} : vector<2x32xf32>, vector<32x32xf32>, vector<2x32xf32> -> vector<2x32xf32>
    %41 = arith.addf %39, %40 : vector<2x32xf32>
    %42 = math.tanh %41 : vector<2x32xf32>
    %43 = vector.extract_strided_slice %10 {offsets = [0, 6, 0], sizes = [2, 1, 32], strides = [1, 1, 1]} : vector<2x8x32xf32> to vector<2x1x32xf32>
    %44 = vector.shape_cast %43 : vector<2x1x32xf32> to vector<2x32xf32>
    %cst_17 = arith.constant dense<0.000000e+00> : vector<2x32xf32>
    %45 = tpu.matmul %42, %11, %cst_17 {dimension_numbers = #tpu.dot_dimension_numbers<[1], [0], [0], [1], [0, 0, 1, 1], [], []>} : vector<2x32xf32>, vector<32x32xf32>, vector<2x32xf32> -> vector<2x32xf32>
    %46 = arith.addf %44, %45 : vector<2x32xf32>
    %47 = math.tanh %46 : vector<2x32xf32>
    %48 = vector.extract_strided_slice %10 {offsets = [0, 7, 0], sizes = [2, 1, 32], strides = [1, 1, 1]} : vector<2x8x32xf32> to vector<2x1x32xf32>
    %49 = vector.shape_cast %48 : vector<2x1x32xf32> to vector<2x32xf32>
    %cst_18 = arith.constant dense<0.000000e+00> : vector<2x32xf32>
    %50 = tpu.matmul %47, %11, %cst_18 {dimension_numbers = #tpu.dot_dimension_numbers<[1], [0], [0], [1], [0, 0, 1, 1], [], []>} : vector<2x32xf32>, vector<32x32xf32>, vector<2x32xf32> -> vector<2x32xf32>
    %51 = arith.addf %49, %50 : vector<2x32xf32>
    %52 = math.tanh %51 : vector<2x32xf32>
    %c0_19 = arith.constant 0 : index
    %c0_20 = arith.constant 0 : index
    %53 = vector.load %arg6[%c0_19, %c0_20] : memref<2x32xf32, #tpu.memory_space<vmem>>, vector<2x32xf32>
    tpu.vector_store %arg6[%c0_19, %c0_20], %52 {strides = array<i32>} : memref<2x32xf32, #tpu.memory_space<vmem>>, vector<2x32xf32>,
    return
  }
  func.func @transform_0(%arg0: i32, %arg1: i32) -> (i32, i32, i32) {
    %c0_i32 = arith.constant 0 : i32
    %c0_i32_0 = arith.constant 0 : i32
    return %arg0, %arg1, %c0_i32 : i32, i32, i32
  }
  func.func @transform_1(%arg0: i32, %arg1: i32) -> (i32, i32) {
    %c0_i32 = arith.constant 0 : i32
    %c0_i32_0 = arith.constant 0 : i32
    %c0_i32_1 = arith.constant 0 : i32
    return %c0_i32, %c0_i32_0 : i32, i32
  }
  func.func @transform_2(%arg0: i32, %arg1: i32) -> (i32, i32) {
    %c0_i32 = arith.constant 0 : i32
    %c0_i32_0 = arith.constant 0 : i32
    %c0_i32_1 = arith.constant 0 : i32
    return %c0_i32, %c0_i32_0 : i32, i32
  }
  func.func @transform_3(%arg0: i32, %arg1: i32) -> (i32, i32) {
    %c0_i32 = arith.constant 0 : i32
    %c0_i32_0 = arith.constant 0 : i32
    %c0_i32_1 = arith.constant 0 : i32
    return %c0_i32, %c0_i32_0 : i32, i32
  }
  func.func @transform_4(%arg0: i32, %arg1: i32) -> (i32, i32) {
    %c0_i32 = arith.constant 0 : i32
    %c0_i32_0 = arith.constant 0 : i32
    return %arg0, %c0_i32 : i32, i32
  }
}

</mosaic_0001>

<bundles_post_ra>
// kernel: rnn_forward.1
= control target key start
LH: loop header
LB: loop body
LE: loop exit
PB: predicated region body
PF: predicated region fallthrough
CT: control target
= control target key end

     0   :  { %vm40_vm0 = vcmask 1043456   ;;  %v1001_v0 = vmov 0.0   ;;  %vm33_vm1 = vcmask 31744   ;;  %vm1002_vm2 = vmmov 0   ;;  %s1190_s2 = inlined_call_operand.vmem [shape: f32[32,32], index: 2, kind: input, shape index: {}]   ;;  %s1191_s1 = inlined_call_operand.vmem [shape: f32[4,32], index: 1, kind: input, shape index: {}]   ;;  %s1192_s0 = inlined_call_operand.vmem [shape: f32[2,8,4], index: 0, kind: input, shape index: {}]   ;;  %s1193_s4 = inlined_call_operand.vmem [shape: f32[2,32], index: 4, kind: output, shape index: {}]   ;;  %s1194_s3 = inlined_call_operand.vmem [shape: f32[1,32], index: 3, kind: input, shape index: {}]  }
   0x1   :  { %879 = vmatprep.subr.mxu1 %v1001_v0  ;;  %v1032_v1 = vld [vmem:[%s1190_s2 + $0x18] sm:$0xff]  ;;  %v25_v2 = vld [vmem:[%s1191_s1] sm:$0xf]  ;;  %887 = vmatprep.mubr.msk.f32.mxu1 %vm1002_vm2, %v1001_v0  ;;  %vm21_vm3 = vcmask 254976   ;;  %v24_v4 = vld [vmem:[%s1192_s0 + $0x8] sm:$0xff]  ;;  %vm124_vm4 = vcmask 261120  }
   0x2   :  { %v23_v3 = vld [vmem:[%s1192_s0] sm:$0xff]  ;;  %880 = vmatpush3.msra.mxu1 %v1032_v1  ;;  %874 = vmatprep.subr.msk.mxu0 %vm40_vm0, %v25_v2  ;;  %v1050_v5 = vld [vmem:[%s1190_s2 + $0x10] sm:$0xff]  ;;  %22 = vst.msk [vmem:[%s1193_s4] sm:$0x3] %vm21_vm3, %v1001_v0  ;;  %v1061_v6 = vld [vmem:[%s1190_s2 + $0x8] sm:$0xff]  ;;  %vm209_vm5 = vcmask 1041409  }
   0x3   :  { %881 = vmatprep.subr.mxu1 %v1001_v0  ;;  %875 = vmatpush3.msk.msra.mxu0 %vm40_vm0, %v25_v2  ;;  %v1068_v7 = vld [vmem:[%s1190_s2] sm:$0xff]  ;;  %vm811_vm6 = vcmask 261127   ;;  %vm813_vm7 = vcmask 253952  }
   0x4   :  { %876 = vmatprep.mubr.msk.f32.mxu0 %vm33_vm1, %v23_v3  ;;  %882 = vmatpush3.msra.mxu1 %v1050_v5  ;;  %v819_v10 = vld [vmem:[%s1194_s3] ss:$0 sm:$0xff] }
   0x5   :  { %877 = vmatmul.mubr.msk.f32.vlgmr.msra.gmra.mxu0 %vm33_vm1, %v24_v4  ;;  %883 = vmatprep.subr.mxu1 %v1001_v0 }
   0x6   :  { %884 = vmatpush3.msra.mxu1 %v1061_v6  ;;  %890 = vmatprep.subr.mxu0 %v1001_v0 }
   0x7   :  { %885 = vmatprep.subr.mxu1 %v1001_v0  ;;  %891 = vmatpush3.msra.mxu0 %v1032_v1 }
   0x8   :  { %886 = vmatpush3.msra.mxu1 %v1068_v7  ;;  %892 = vmatprep.subr.mxu0 %v1001_v0 }
   0x9   :  { %v123_v8 = vld [vmem:[%s1193_s4] sm:$0x3]  ;;  %893 = vmatpush3.msra.mxu0 %v1050_v5  ;;  %898 = vmatprep.mubr.msk.f32.mxu0 %vm1002_vm2, %v1001_v0 }
   0xa   :  { %888 = vmatmul.mubr.msk.f32.vlgmr.msra.gmra.mxu1 %vm124_vm4, %v123_v8  ;;  %894 = vmatprep.subr.mxu0 %v1001_v0 }
   0xb   :  { %895 = vmatpush3.msra.mxu0 %v1061_v6  ;;  %901 = vmatprep.subr.mxu1 %v1001_v0 }
   0xc   :  { %896 = vmatprep.subr.mxu0 %v1001_v0  ;;  %902 = vmatpush3.msra.mxu1 %v1032_v1 }
   0xd   :  { %897 = vmatpush3.msra.mxu0 %v1068_v7  ;;  %903 = vmatprep.subr.mxu1 %v1001_v0 }
   0xe   :  { %904 = vmatpush3.msra.mxu1 %v1050_v5  ;;  %909 = vmatprep.mubr.msk.f32.mxu1 %vm1002_vm2, %v1001_v0 }
   0xf   :  { %905 = vmatprep.subr.mxu1 %v1001_v0  ;;  %912 = vmatprep.subr.mxu0 %v1001_v0 }
  0x10   :  { %906 = vmatpush3.msra.mxu1 %v1061_v6 }
  0x11   :  { %907 = vmatprep.subr.mxu1 %v1001_v0 }
  0x12   :  { %908 = vmatpush3.msra.mxu1 %v1068_v7 }
  0x13   :  { %923 = vmatprep.subr.mxu1 %v1001_v0 }
  0xc5   :  { %v878_v9 = vpop.f32.mrf.mxu0 }
  0xc6   :  { %v1102_v12 = vadd.f32 %v878_v9, %v819_v10 }
  0xc7   :  { %v110_v11 = vpop.f32.mrf.mxu0 }
  0xc8   :  { %v1104_v13 = vadd.f32 %v819_v10, %v110_v11 }
  0xca   :  { %v194_v14 = vpop.f32.mrf.mxu1 }
  0xcb   :  { %v199_v15 = vrot.slane %v194_v14, 1  ;;  %v202_v17 = vadd.f32 %v194_v14, %v1104_v13 }
  0xcc   :  { %v889_v16 = vpop.f32.mrf.mxu1 }
  0xcd   :  { %v203_v18 = vadd.f32 %v199_v15, %v1102_v12 }
  0xcf   :  { %969 = vtanh.f32 %v203_v18 }
  0xd0   :  { %971 = vtanh.f32 %v202_v17 }
  0xdc   :  { %v970_v19 = vpop.eup %969 }
  0xdd   :  { %v208_v20 = vrot.slane %v970_v19, 7  ;;  %v972_v21 = vpop.eup %971 }
  0xdf   :  { %v210_v22 = vsel %vm209_vm5, %v208_v20, %v972_v21 }
  0xe0   :  { %899 = vmatmul.mubr.msk.f32.vlgmr.msra.gmra.mxu0 %vm124_vm4, %v210_v22 }
  0xe1   :  { %913 = vmatpush3.msra.mxu0 %v1032_v1  ;;  %920 = vmatprep.mubr.msk.f32.mxu0 %vm1002_vm2, %v1001_v0 }
  0xe2   :  { %914 = vmatprep.subr.mxu0 %v1001_v0 }
  0xe3   :  { %915 = vmatpush3.msra.mxu0 %v1050_v5 }
  0xe4   :  { %916 = vmatprep.subr.mxu0 %v1001_v0 }
  0xe5   :  { %917 = vmatpush3.msra.mxu0 %v1061_v6 }
  0xe6   :  { %918 = vmatprep.subr.mxu0 %v1001_v0 }
  0xe7   :  { %919 = vmatpush3.msra.mxu0 %v1068_v7 }
  0xe8   :  { %934 = vmatprep.subr.mxu0 %v1001_v0 }
 0x1a0   :  { %v279_v23 = vpop.f32.mrf.mxu0 }
 0x1a1   :  { %v284_v24 = vrot.slane %v279_v23, 7  ;;  %v288_v27 = vadd.f32 %v279_v23, %v1102_v12 }
 0x1a2   :  { %v900_v25 = vpop.f32.mrf.mxu0 }
 0x1a3   :  { %v287_v26 = vadd.f32 %v284_v24, %v1104_v13 }
 0x1a5   :  { %973 = vtanh.f32 %v287_v26 }
 0x1a6   :  { %975 = vtanh.f32 %v288_v27 }
 0x1b2   :  { %v974_v28 = vpop.eup %973 }
 0x1b3   :  { %v293_v29 = vrot.slane %v974_v28, 1  ;;  %v976_v30 = vpop.eup %975 }
 0x1b5   :  { %v294_v31 = vsel %vm209_vm5, %v976_v30, %v293_v29 }
 0x1b6   :  { %910 = vmatmul.mubr.msk.f32.vlgmr.msra.gmra.mxu1 %vm124_vm4, %v294_v31 }
 0x1b7   :  { %924 = vmatpush3.msra.mxu1 %v1032_v1  ;;  %931 = vmatprep.mubr.msk.f32.mxu1 %vm1002_vm2, %v1001_v0 }
 0x1b8   :  { %925 = vmatprep.subr.mxu1 %v1001_v0 }
 0x1b9   :  { %926 = vmatpush3.msra.mxu1 %v1050_v5 }
 0x1ba   :  { %927 = vmatprep.subr.mxu1 %v1001_v0 }
 0x1bb   :  { %928 = vmatpush3.msra.mxu1 %v1061_v6 }
 0x1bc   :  { %929 = vmatprep.subr.mxu1 %v1001_v0 }
 0x1bd   :  { %930 = vmatpush3.msra.mxu1 %v1068_v7 }
 0x1be   :  { %945 = vmatprep.subr.mxu1 %v1001_v0 }
 0x276   :  { %v363_v32 = vpop.f32.mrf.mxu1 }
 0x277   :  { %v368_v33 = vrot.slane %v363_v32, 6  ;;  %v369_v34 = vrot.slane %v363_v32, 7 }
 0x278   :  { %v911_v35 = vpop.f32.mrf.mxu1 }
 0x279   :  { %v372_v36 = vadd.f32 %v368_v33, %v1104_v13  ;;  %v373_v37 = vadd.f32 %v369_v34, %v1102_v12 }
 0x27b   :  { %977 = vtanh.f32 %v372_v36 }
 0x27c   :  { %979 = vtanh.f32 %v373_v37 }
 0x288   :  { %v978_v38 = vpop.eup %977 }
 0x289   :  { %v980_v39 = vpop.eup %979  ;;  %v378_v40 = vrot.slane %v978_v38, 2 }
 0x28a   :  { %v379_v41 = vrot.slane %v980_v39, 1 }
 0x28c   :  { %v380_v42 = vsel %vm209_vm5, %v379_v41, %v378_v40 }
 0x28d   :  { %921 = vmatmul.mubr.msk.f32.vlgmr.msra.gmra.mxu0 %vm124_vm4, %v380_v42 }
 0x28e   :  { %935 = vmatpush3.msra.mxu0 %v1032_v1  ;;  %942 = vmatprep.mubr.msk.f32.mxu0 %vm1002_vm2, %v1001_v0 }
 0x28f   :  { %936 = vmatprep.subr.mxu0 %v1001_v0 }
 0x290   :  { %937 = vmatpush3.msra.mxu0 %v1050_v5 }
 0x291   :  { %938 = vmatprep.subr.mxu0 %v1001_v0 }
 0x292   :  { %939 = vmatpush3.msra.mxu0 %v1061_v6 }
 0x293   :  { %940 = vmatprep.subr.mxu0 %v1001_v0 }
 0x294   :  { %941 = vmatpush3.msra.mxu0 %v1068_v7 }
 0x295   :  { %956 = vmatprep.subr.mxu0 %v1001_v0 }
 0x34d   :  { %v449_v43 = vpop.f32.mrf.mxu0 }
 0x34e   :  { %v454_v44 = vrot.slane %v449_v43, 5  ;;  %v455_v45 = vrot.slane %v449_v43, 6 }
 0x34f   :  { %v922_v46 = vpop.f32.mrf.mxu0 }
 0x350   :  { %v458_v47 = vadd.f32 %v454_v44, %v1104_v13  ;;  %v459_v48 = vadd.f32 %v455_v45, %v1102_v12 }
 0x352   :  { %981 = vtanh.f32 %v458_v47 }
 0x353   :  { %983 = vtanh.f32 %v459_v48 }
 0x35f   :  { %v982_v49 = vpop.eup %981 }
 0x360   :  { %v984_v50 = vpop.eup %983  ;;  %v464_v51 = vrot.slane %v982_v49, 3 }
 0x361   :  { %v465_v52 = vrot.slane %v984_v50, 2 }
 0x363   :  { %v466_v53 = vsel %vm209_vm5, %v465_v52, %v464_v51 }
 0x364   :  { %932 = vmatmul.mubr.msk.f32.vlgmr.msra.gmra.mxu1 %vm124_vm4, %v466_v53 }
 0x365   :  { %946 = vmatpush3.msra.mxu1 %v1032_v1  ;;  %953 = vmatprep.mubr.msk.f32.mxu1 %vm1002_vm2, %v1001_v0 }
 0x366   :  { %947 = vmatprep.subr.mxu1 %v1001_v0 }
 0x367   :  { %948 = vmatpush3.msra.mxu1 %v1050_v5 }
 0x368   :  { %949 = vmatprep.subr.mxu1 %v1001_v0 }
 0x369   :  { %950 = vmatpush3.msra.mxu1 %v1061_v6 }
 0x36a   :  { %951 = vmatprep.subr.mxu1 %v1001_v0 }
 0x36b   :  { %952 = vmatpush3.msra.mxu1 %v1068_v7 }
 0x424   :  { %v535_v54 = vpop.f32.mrf.mxu1 }
 0x425   :  { %v540_v55 = vrot.slane %v535_v54, 4  ;;  %v541_v56 = vrot.slane %v535_v54, 5 }
 0x426   :  { %v933_v57 = vpop.f32.mrf.mxu1 }
 0x427   :  { %v544_v58 = vadd.f32 %v540_v55, %v1104_v13  ;;  %v545_v59 = vadd.f32 %v541_v56, %v1102_v12 }
 0x429   :  { %985 = vtanh.f32 %v544_v58 }
 0x42a   :  { %987 = vtanh.f32 %v545_v59 }
 0x436   :  { %v986_v60 = vpop.eup %985 }
 0x437   :  { %v988_v61 = vpop.eup %987  ;;  %v550_v62 = vrot.slane %v986_v60, 4 }
 0x438   :  { %v551_v63 = vrot.slane %v988_v61, 3 }
 0x43a   :  { %v552_v2 = vsel %vm209_vm5, %v551_v63, %v550_v62 }
 0x43b   :  { %943 = vmatmul.mubr.msk.f32.vlgmr.msra.gmra.mxu0 %vm124_vm4, %v552_v2 }
 0x43c   :  { %957 = vmatpush3.msra.mxu0 %v1032_v1  ;;  %964 = vmatprep.mubr.msk.f32.mxu0 %vm1002_vm2, %v1001_v0 }
 0x43d   :  { %958 = vmatprep.subr.mxu0 %v1001_v0 }
 0x43e   :  { %959 = vmatpush3.msra.mxu0 %v1050_v5 }
 0x43f   :  { %960 = vmatprep.subr.mxu0 %v1001_v0 }
 0x440   :  { %961 = vmatpush3.msra.mxu0 %v1061_v6 }
 0x441   :  { %962 = vmatprep.subr.mxu0 %v1001_v0 }
 0x442   :  { %963 = vmatpush3.msra.mxu0 %v1068_v7 }
 0x4fb   :  { %v621_v3 = vpop.f32.mrf.mxu0 }
 0x4fc   :  { %v626_v4 = vrot.slane %v621_v3, 3  ;;  %v627_v8 = vrot.slane %v621_v3, 4 }
 0x4fd   :  { %v944_v9 = vpop.f32.mrf.mxu0 }
 0x4fe   :  { %v630_v1 = vadd.f32 %v626_v4, %v1104_v13  ;;  %v631_v10 = vadd.f32 %v627_v8, %v1102_v12 }
 0x500   :  { %989 = vtanh.f32 %v630_v1 }
 0x501   :  { %991 = vtanh.f32 %v631_v10 }
 0x50d   :  { %v990_v11 = vpop.eup %989 }
 0x50e   :  { %v992_v5 = vpop.eup %991  ;;  %v636_v14 = vrot.slane %v990_v11, 5 }
 0x50f   :  { %v637_v15 = vrot.slane %v992_v5, 4 }
 0x511   :  { %v638_v6 = vsel %vm209_vm5, %v637_v15, %v636_v14 }
 0x512   :  { %954 = vmatmul.mubr.msk.f32.vlgmr.msra.gmra.mxu1 %vm124_vm4, %v638_v6 }
 0x5d2   :  { %v707_v0 = vpop.f32.mrf.mxu1 }
 0x5d3   :  { %v712_v7 = vrot.slane %v707_v0, 2  ;;  %v713_v16 = vrot.slane %v707_v0, 3 }
 0x5d4   :  { %v955_v17 = vpop.f32.mrf.mxu1 }
 0x5d5   :  { %v716_v18 = vadd.f32 %v712_v7, %v1104_v13  ;;  %v717_v19 = vadd.f32 %v713_v16, %v1102_v12 }
 0x5d7   :  { %993 = vtanh.f32 %v716_v18 }
 0x5d8   :  { %995 = vtanh.f32 %v717_v19 }
 0x5e4   :  { %v994_v20 = vpop.eup %993 }
 0x5e5   :  { %v996_v21 = vpop.eup %995  ;;  %v722_v22 = vrot.slane %v994_v20, 6 }
 0x5e6   :  { %v723_v23 = vrot.slane %v996_v21, 5 }
 0x5e8   :  { %v724_v24 = vsel %vm209_vm5, %v723_v23, %v722_v22 }
 0x5e9   :  { %965 = vmatmul.mubr.msk.f32.vlgmr.msra.gmra.mxu0 %vm124_vm4, %v724_v24 }
 0x6a9   :  { %v793_v25 = vpop.f32.mrf.mxu0 }
 0x6aa   :  { %v798_v26 = vrot.slane %v793_v25, 1  ;;  %v799_v27 = vrot.slane %v793_v25, 2 }
 0x6ab   :  { %v966_v28 = vpop.f32.mrf.mxu0 }
 0x6ac   :  { %v802_v29 = vadd.f32 %v798_v26, %v1104_v13  ;;  %v803_v30 = vadd.f32 %v799_v27, %v1102_v12 }
 0x6ae   :  { %997 = vtanh.f32 %v802_v29 }
 0x6af   :  { %999 = vtanh.f32 %v803_v30 }
 0x6bb   :  { %v998_v31 = vpop.eup %997 }
 0x6bc   :  { %v1000_v32 = vpop.eup %999  ;;  %812 = vst.msk [vmem:[%s1193_s4 - $0x7] sm:$0x80] %vm811_vm6, %v998_v31 }
 0x6bd   :  { %v808_v33 = vrot.slane %v1000_v32, 7 }
 0x6bf   :  { %814 = vst.msk [vmem:[%s1193_s4 + $0x1] sm:$0x1] %vm813_vm7, %v808_v33 }

</bundles_post_ra>
